<compile_context>
chip_gen: v7x
topology: tpu7x:2x2x1
jax: 0.10.0
libtpu: 0.0.40
codegen_flags: <defaults>
</compile_context>

<pallas_src>
import functools
import numpy as np
import jax
import jax.numpy as jnp
from jax.experimental import pallas as pl
from jax.experimental.pallas import tpu as pltpu

# ---------------- configuration (small synthetic shapes) ---------------------
T = 2                  # number of frames in im_data
CIN = 3                # image channels
IMG = 32               # image H = W
STRIDE = 4             # backbone feature stride (stand-in for 16)
BASE_C = 32            # backbone feature channels (stand-in for 1024)
HF = IMG // STRIDE     # feature map H = W
POOL = 7               # ROIAlign output size
SPATIAL_SCALE = 1.0 / STRIDE
HEAD_DIM = 128         # _head_to_tail output dim (stand-in for 2048)
NUM_CLASSES = 11       # len(object_classes), class 0 = background
MASK_SIZE = 27         # draw_union_boxes pooling size


def _round_up(x, m):
    return ((x + m - 1) // m) * m


def _pad2d(a, rows, cols):
    return jnp.pad(a, ((0, rows - a.shape[0]), (0, cols - a.shape[1])))


# ---------------- tiled linear (conv stand-in) --------------------------------
def _matmul_kernel(x_ref, w_ref, b_ref, o_ref, acc_ref, *, activation):
    k = pl.program_id(1)

    @pl.when(k == 0)
    def _():
        acc_ref[...] = jnp.zeros_like(acc_ref)

    acc_ref[...] += jnp.dot(x_ref[...], w_ref[...],
                            preferred_element_type=jnp.float32)

    @pl.when(k == pl.num_programs(1) - 1)
    def _():
        out = acc_ref[...] + b_ref[...]
        if activation == "relu":
            out = jnp.maximum(out, 0.0)
        o_ref[...] = out.astype(o_ref.dtype)


def pallas_linear(x, w, b, activation=None, tm=256, tk=512):
    """act(x @ w + b); tiled over (M, K), N padded to a 128-lane-dense width."""
    M, K = x.shape
    N = w.shape[1]
    Npad = _round_up(N, 128)
    tm_eff = min(tm, _round_up(M, 8))
    tk_eff = min(tk, _round_up(K, 128))
    Mp = _round_up(M, tm_eff)
    Kp = _round_up(K, tk_eff)
    x_p = _pad2d(x, Mp, Kp)
    w_p = _pad2d(w, Kp, Npad)
    b_p = _pad2d(b.reshape(1, N), 1, Npad)
    nm, nk = Mp // tm_eff, Kp // tk_eff

    out = pl.pallas_call(
        functools.partial(_matmul_kernel, activation=activation),
        out_shape=jax.ShapeDtypeStruct((Mp, Npad), jnp.float32),
        grid=(nm, nk),
        in_specs=[pl.BlockSpec((tm_eff, tk_eff), lambda i, k: (i, k)),
                  pl.BlockSpec((tk_eff, Npad), lambda i, k: (k, 0)),
                  pl.BlockSpec((1, Npad), lambda i, k: (0, 0))],
        out_specs=pl.BlockSpec((tm_eff, Npad), lambda i, k: (i, 0)),
        scratch_shapes=[pltpu.VMEM((tm_eff, Npad), jnp.float32)],
        compiler_params=pltpu.CompilerParams(
            dimension_semantics=("parallel", "arbitrary")),
    )(x_p, w_p, b_p)
    return out[:M, :N]


# ---------------- fused head_to_tail + cls_score + softmax/argmax -------------
def _head_cls_kernel(x_ref, hw_ref, hb_ref, cw_ref, cb_ref,
                     feat_ref, dist_ref, aux_ref, acc_ref, *, num_classes):
    k = pl.program_id(1)

    @pl.when(k == 0)
    def _():
        acc_ref[...] = jnp.zeros_like(acc_ref)

    acc_ref[...] += jnp.dot(x_ref[...], hw_ref[...],
                            preferred_element_type=jnp.float32)

    @pl.when(k == pl.num_programs(1) - 1)
    def _():
        feat = jnp.maximum(acc_ref[...] + hb_ref[...], 0.0)      # (TM, HEAD_DIM)
        feat_ref[...] = feat.astype(feat_ref.dtype)

        # classifier on the still-resident VMEM feature tile (lane-dense 128 cols)
        logits = jnp.dot(feat, cw_ref[...],
                         preferred_element_type=jnp.float32) + cb_ref[...]
        col = jax.lax.broadcasted_iota(jnp.int32, logits.shape, 1)
        valid = (col >= 1) & (col < num_classes)     # drop bg + padded columns
        logits = jnp.where(valid, logits, jnp.full_like(logits, -1e30))

        m = jnp.max(logits, axis=1, keepdims=True)
        e = jnp.exp(logits - m)
        denom = jnp.sum(e, axis=1, keepdims=True)
        dist = e * pl.reciprocal(denom, approx=True)
        dist_ref[...] = dist

        mx = jnp.max(dist, axis=1, keepdims=True)
        cand = jnp.where(dist >= mx, col, logits.shape[1])
        label = jnp.min(cand, axis=1, keepdims=True)   # == fg argmax + 1
        aux = jnp.where(col == 0, mx,
                        jnp.where(col == 1, label.astype(jnp.float32), 0.0))
        aux_ref[...] = aux                              # packed score/label slab


def pallas_head_cls(pooled, hw, hb, cw, cb, num_classes, tm=128, tk=512):
    M, K = pooled.shape
    HD = hw.shape[1]
    NCP = _round_up(cw.shape[1], 128)
    cw_p = _pad2d(cw, HD, NCP)
    cb_p = _pad2d(cb.reshape(1, -1), 1, NCP)

    tm_eff = min(tm, _round_up(M, 8))
    tk_eff = min(tk, _round_up(K, 128))
    Mp = _round_up(M, tm_eff)
    Kp = _round_up(K, tk_eff)
    x_p = _pad2d(pooled, Mp, Kp)
    hw_p = _pad2d(hw, Kp, HD)
    hb_p = hb.reshape(1, HD)
    nm, nk = Mp // tm_eff, Kp // tk_eff

    feats, dist, aux = pl.pallas_call(
        functools.partial(_head_cls_kernel, num_classes=num_classes),
        out_shape=(jax.ShapeDtypeStruct((Mp, HD), jnp.float32),
                   jax.ShapeDtypeStruct((Mp, NCP), jnp.float32),
                   jax.ShapeDtypeStruct((Mp, NCP), jnp.float32)),
        grid=(nm, nk),
        in_specs=[pl.BlockSpec((tm_eff, tk_eff), lambda i, k: (i, k)),
                  pl.BlockSpec((tk_eff, HD), lambda i, k: (k, 0)),
                  pl.BlockSpec((1, HD), lambda i, k: (0, 0)),
                  pl.BlockSpec((HD, NCP), lambda i, k: (0, 0)),
                  pl.BlockSpec((1, NCP), lambda i, k: (0, 0))],
        out_specs=(pl.BlockSpec((tm_eff, HD), lambda i, k: (i, 0)),
                   pl.BlockSpec((tm_eff, NCP), lambda i, k: (i, 0)),
                   pl.BlockSpec((tm_eff, NCP), lambda i, k: (i, 0))),
        scratch_shapes=[pltpu.VMEM((tm_eff, HD), jnp.float32)],
        compiler_params=pltpu.CompilerParams(
            dimension_semantics=("parallel", "arbitrary")),
    )(x_p, hw_p, hb_p, cw_p, cb_p)

    features = feats[:M]
    distributions = dist[:M, 1:num_classes]
    scores = aux[:M, 0]
    labels = aux[:M, 1].astype(jnp.int32)
    return features, distributions, scores, labels


# ---------------- Pallas ROIAlign (scalar-prefetch frame index) ----------------
def _roi_align_kernel(fidx_ref, rois_ref, feat_ref, o_ref, *,
                      hf, wf, pool, spatial_scale):
    del fidx_ref  # only used in the index_map
    box = rois_ref[0]                               # (1, 8): [fidx, x1,y1,x2,y2,...]
    x1 = box[:, 1:2] * spatial_scale                # (1,1)
    y1 = box[:, 2:3] * spatial_scale
    x2 = box[:, 3:4] * spatial_scale
    y2 = box[:, 4:5] * spatial_scale
    bw = jnp.maximum(x2 - x1, 1.0) * (1.0 / pool)
    bh = jnp.maximum(y2 - y1, 1.0) * (1.0 / pool)

    # combined bilinear interpolation matrix W[(y*wf + x), (py*pool + px)]
    nr, nc = hf * wf, pool * pool
    ri = jax.lax.broadcasted_iota(jnp.int32, (nr, nc), 0).astype(jnp.float32)
    ci = jax.lax.broadcasted_iota(jnp.int32, (nr, nc), 1).astype(jnp.float32)
    gy = jnp.floor(ri / wf)
    gx = ri - gy * wf
    py = jnp.floor(ci / pool)
    px = ci - py * pool
    sy = jnp.clip(y1 + (py + 0.5) * bh, 0.0, hf - 1.0)
    sx = jnp.clip(x1 + (px + 0.5) * bw, 0.0, wf - 1.0)
    w = (jnp.maximum(0.0, 1.0 - jnp.abs(sy - gy)) *
         jnp.maximum(0.0, 1.0 - jnp.abs(sx - gx)))          # (hf*wf, pool*pool)

    feat = feat_ref[0]                                      # (C, hf*wf)
    o_ref[0] = jnp.dot(feat, w, preferred_element_type=jnp.float32)


def pallas_roi_align(feats_nchw, rois, pool, spatial_scale):
    """ROIAlign (bin-center sampling).  Returns (N, C, pool*pool)."""
    t, c, hf, wf = feats_nchw.shape
    n = rois.shape[0]
    feats2 = feats_nchw.reshape(t, c, hf * wf)
    rois_pad = jnp.zeros((n, 1, 8), jnp.float32).at[:, 0, :5].set(rois)
    fidx = rois[:, 0].astype(jnp.int32)

    kernel = functools.partial(_roi_align_kernel, hf=hf, wf=wf, pool=pool,
                               spatial_scale=spatial_scale)
    pooled = pl.pallas_call(
        kernel,
        out_shape=jax.ShapeDtypeStruct((n, c, pool * pool), jnp.float32),
        grid_spec=pltpu.PrefetchScalarGridSpec(
            num_scalar_prefetch=1,
            grid=(n,),
            in_specs=[pl.BlockSpec((1, 1, 8), lambda r, f: (r, 0, 0)),
                      pl.BlockSpec((1, c, hf * wf), lambda r, f: (f[r], 0, 0))],
            out_specs=pl.BlockSpec((1, c, pool * pool), lambda r, f: (r, 0, 0))),
        compiler_params=pltpu.CompilerParams(
            dimension_semantics=("arbitrary",)),
    )(fidx, rois_pad, feats2)
    return pooled


# ---------------- spatial masks (draw_union_boxes - 0.5) ----------------------
def _spatial_mask_kernel(rois_ref, o_ref):
    r = rois_ref[...]                                    # (Np, 8)
    x1a, y1a, x2a, y2a = r[:, 0:1], r[:, 1:2], r[:, 2:3], r[:, 3:4]
    x1b, y1b, x2b, y2b = r[:, 4:5], r[:, 5:6], r[:, 6:7], r[:, 7:8]
    ux1 = jnp.minimum(x1a, x1b)
    uy1 = jnp.minimum(y1a, y1b)
    ux2 = jnp.maximum(x2a, x2b)
    uy2 = jnp.maximum(y2a, y2b)
    sx = MASK_SIZE / jnp.maximum(ux2 - ux1, 1e-3)
    sy = MASK_SIZE / jnp.maximum(uy2 - uy1, 1e-3)

    mm = MASK_SIZE * MASK_SIZE
    n_pairs = r.shape[0]
    j = jax.lax.broadcasted_iota(jnp.int32, (n_pairs, 2 * mm), 1).astype(jnp.float32)
    which = jnp.floor(j / mm)                            # 0.0 -> box a, 1.0 -> box b
    rem = j - which * mm
    row = jnp.floor(rem / MASK_SIZE)
    yy = row + 0.5
    xx = rem - row * MASK_SIZE + 0.5
    is_b = which > 0.5

    bx1 = jnp.where(is_b, x1b, x1a)
    bx2 = jnp.where(is_b, x2b, x2a)
    by1 = jnp.where(is_b, y1b, y1a)
    by2 = jnp.where(is_b, y2b, y2a)
    gx1 = (bx1 - ux1) * sx
    gx2 = (bx2 - ux1) * sx
    gy1 = (by1 - uy1) * sy
    gy2 = (by2 - uy1) * sy
    inside = (xx >= gx1) & (xx <= gx2) & (yy >= gy1) & (yy <= gy2)
    o_ref[...] = jnp.where(inside, 1.0, 0.0) - 0.5


def pallas_spatial_masks(pair_rois):
    n_pairs = pair_rois.shape[0]
    flat = pl.pallas_call(
        _spatial_mask_kernel,
        out_shape=jax.ShapeDtypeStruct((n_pairs, 2 * MASK_SIZE * MASK_SIZE),
                                       jnp.float32),
        grid=(1,),
        in_specs=[pl.BlockSpec((n_pairs, 8), lambda i: (0, 0))],
        out_specs=pl.BlockSpec((n_pairs, 2 * MASK_SIZE * MASK_SIZE),
                               lambda i: (0, 0)),
        compiler_params=pltpu.CompilerParams(dimension_semantics=("arbitrary",)),
    )(pair_rois)
    return flat.reshape(n_pairs, 2, MASK_SIZE, MASK_SIZE)


# ---------------- backbone stand-in (im2col + Pallas matmul) -------------------
def _im2col_3x3(x_nchw, stride):
    # TODO(synk): im2col kept in JAX glue; fusing the 9 taps into the Pallas
    # conv kernel would remove the 9x patch-tensor HBM round trip at real scale.
    t, c, h, w = x_nchw.shape
    x = jnp.transpose(x_nchw, (0, 2, 3, 1))              # NHWC
    x = jnp.pad(x, ((0, 0), (1, 1), (1, 1), (0, 0)))
    ho, wo = h // stride, w // stride
    cols = []
    for dy in range(3):
        for dx in range(3):
            cols.append(x[:, dy:dy + stride * ho:stride,
                          dx:dx + stride * wo:stride, :])
    patches = jnp.concatenate(cols, axis=-1)             # [t, ho, wo, 9*c]
    return patches.reshape(t * ho * wo, 9 * c), (t, ho, wo)


def rcnn_base(im_data, params):
    """Stand-in for fasterRCNN.RCNN_base: 3x3/stride-4 conv + ReLU."""
    # single pallas_call over all frames (equivalent to the chunks-of-10 loop)
    patches, (t, ho, wo) = _im2col_3x3(im_data, STRIDE)
    feat = pallas_linear(patches, params["conv_w"], params["conv_b"],
                         activation="relu")
    feat = feat.reshape(t, ho, wo, BASE_C)
    return jnp.transpose(feat, (0, 3, 1, 2))             # NCHW, like PyTorch


# ---------------- detector.forward --------------------------------------------
def detector_forward(im_data, im_info, gt_boxes, num_boxes, gt_annotation,
                     im_all, params, predict_flag=False):
    # ---- host-side parsing of gt_annotation (same as the PyTorch loops) ----
    bbox_num = 0
    im_idx, pair, a_rel, s_rel, c_rel = [], [], [], [], []
    for i in gt_annotation:
        bbox_num += len(i)
    FINAL_BBOXES_np = np.zeros([bbox_num, 5], dtype=np.float32)
    FINAL_LABELS_np = np.zeros([bbox_num], dtype=np.int32)   # TODO(synk): torch int64
    HUMAN_IDX_np = np.zeros([len(gt_annotation), 1], dtype=np.int32)
    bbox_idx = 0
    for i, j in enumerate(gt_annotation):
        for m in j:
            if "person_bbox" in m.keys():
                FINAL_BBOXES_np[bbox_idx, 1:] = m["person_bbox"][0]
                FINAL_BBOXES_np[bbox_idx, 0] = i
                FINAL_LABELS_np[bbox_idx] = 1
                HUMAN_IDX_np[i] = bbox_idx
                bbox_idx += 1
            elif "bbox" in m.keys():
                FINAL_BBOXES_np[bbox_idx, 1:] = m["bbox"]
                FINAL_BBOXES_np[bbox_idx, 0] = i
                FINAL_LABELS_np[bbox_idx] = m["class"]
                im_idx.append(i)
                pair.append([int(HUMAN_IDX_np[i, 0]), bbox_idx])
                a_rel.append(m["attention_relationship"].tolist())
                s_rel.append(m["spatial_relationship"].tolist())
                c_rel.append(m["contacting_relationship"].tolist())
                bbox_idx += 1
            else:
                continue
    pair = jnp.array(pair, dtype=jnp.int32)
    im_idx = jnp.array(im_idx, dtype=jnp.float32)
    FINAL_BBOXES = jnp.asarray(FINAL_BBOXES_np)
    FINAL_LABELS = jnp.asarray(FINAL_LABELS_np)
    HUMAN_IDX = jnp.asarray(HUMAN_IDX_np)

    # ---- backbone (all frames in one pipelined pallas_call) ----
    FINAL_BASE_FEATURES = rcnn_base(im_data, params)          # [T, C, Hf, Wf]

    scale = im_info[0, 2]
    FINAL_BBOXES = FINAL_BBOXES.at[:, 1:].multiply(scale)

    # ---- ROIAlign (Pallas scalar-prefetch kernel) ----
    pooled = pallas_roi_align(FINAL_BASE_FEATURES, FINAL_BBOXES,
                              POOL, SPATIAL_SCALE)            # [N, C, P*P]

    # ---- fused _head_to_tail + RCNN_cls_score + softmax/argmax ----
    (FINAL_FEATURES, FINAL_DISTRIBUTIONS,
     FINAL_SCORES, PRED_LABELS) = pallas_head_cls(
        pooled.reshape(bbox_num, -1),
        params["head_w"], params["head_b"],
        params["cls_w"], params["cls_b"], NUM_CLASSES)

    # ---- union features ----
    union_boxes = jnp.concatenate(
        (im_idx[:, None],
         jnp.minimum(FINAL_BBOXES[pair[:, 0], 1:3], FINAL_BBOXES[pair[:, 1], 1:3]),
         jnp.maximum(FINAL_BBOXES[pair[:, 0], 3:5], FINAL_BBOXES[pair[:, 1], 3:5])),
        axis=1)
    union_feat = pallas_roi_align(FINAL_BASE_FEATURES, union_boxes,
                                  POOL, SPATIAL_SCALE)
    union_feat = union_feat.reshape(union_boxes.shape[0], BASE_C, POOL, POOL)

    FINAL_BBOXES = FINAL_BBOXES.at[:, 1:].divide(scale)
    pair_rois = jnp.concatenate((FINAL_BBOXES[pair[:, 0], 1:],
                                 FINAL_BBOXES[pair[:, 1], 1:]), axis=1)
    spatial_masks = pallas_spatial_masks(pair_rois)            # [Np, 2, 27, 27]

    entry = {
        "boxes": FINAL_BBOXES,
        "labels": FINAL_LABELS if predict_flag is False else PRED_LABELS,
        "scores": FINAL_SCORES,
        "distribution": FINAL_DISTRIBUTIONS,
        "im_idx": im_idx,
        "pair_idx": pair,
        "human_idx": HUMAN_IDX,
        "features": FINAL_FEATURES,
        "union_feat": union_feat,
        "union_box": union_boxes,
        "spatial_masks": spatial_masks,
        "attention_gt": a_rel,
        "spatial_gt": s_rel,
        "contacting_gt": c_rel,
    }
    return entry


# ---------------- main ---------------------------------------------------------
if __name__ == "__main__":
    key = jax.random.PRNGKey(0)
    k_im, k_conv, k_head, k_cls = jax.random.split(key, 4)

    im_data = jax.random.normal(k_im, (T, CIN, IMG, IMG), jnp.float32)  # NCHW
    im_info = jnp.array([[float(IMG), float(IMG), 1.0]] * T, jnp.float32)

    # deterministic synthetic parameters
    # TODO(synk): real ResNet-101 weights / faster_rcnn_ag.pth not loadable here.
    params = {
        "conv_w": 0.1 * jax.random.normal(k_conv, (CIN * 9, BASE_C), jnp.float32),
        "conv_b": jnp.zeros((BASE_C,), jnp.float32),
        "head_w": 0.05 * jax.random.normal(k_head, (BASE_C * POOL * POOL, HEAD_DIM),
                                           jnp.float32),
        "head_b": jnp.zeros((HEAD_DIM,), jnp.float32),
        "cls_w": 0.05 * jax.random.normal(k_cls, (HEAD_DIM, NUM_CLASSES), jnp.float32),
        "cls_b": jnp.zeros((NUM_CLASSES,), jnp.float32),
    }

    gt_annotation = [
        [
            {"person_bbox": np.array([[4.0, 4.0, 20.0, 26.0]], dtype=np.float32)},
            {"bbox": np.array([10.0, 8.0, 30.0, 22.0], dtype=np.float32), "class": 3,
             "attention_relationship": np.array([0]),
             "spatial_relationship": np.array([1, 2]),
             "contacting_relationship": np.array([4])},
            {"bbox": np.array([2.0, 14.0, 16.0, 30.0], dtype=np.float32), "class": 5,
             "attention_relationship": np.array([1]),
             "spatial_relationship": np.array([0]),
             "contacting_relationship": np.array([2, 3])},
        ],
        [
            {"person_bbox": np.array([[6.0, 2.0, 24.0, 28.0]], dtype=np.float32)},
            {"bbox": np.array([12.0, 10.0, 28.0, 24.0], dtype=np.float32), "class": 7,
             "attention_relationship": np.array([2]),
             "spatial_relationship": np.array([3]),
             "contacting_relationship": np.array([1])},
        ],
    ]

    entry = detector_forward(im_data, im_info, None, None, gt_annotation, None,
                             params, predict_flag=False)

    jax.block_until_ready((entry["features"], entry["union_feat"],
                           entry["spatial_masks"], entry["scores"],
                           entry["distribution"], entry["boxes"],
                           entry["union_box"], entry["labels"]))
    print("KERNEL_OK")
</pallas_src>

<mosaic_0001>
module attributes {stable_mosaic.version = 11 : i64} {
  func.func @_matmul_kernel(%arg0: i32, %arg1: i32, %arg2: memref<128x128xf32, #tpu.memory_space<vmem>>, %arg3: memref<128x128xf32, #tpu.memory_space<vmem>>, %arg4: memref<1x128xf32, #tpu.memory_space<vmem>>, %arg5: memref<128x128xf32, #tpu.memory_space<vmem>>, %arg6: memref<128x128xf32, #tpu.memory_space<vmem>>) attributes {dimension_semantics = [#tpu.dimension_semantics<parallel>, #tpu.dimension_semantics<arbitrary>], iteration_bounds = array<i64: 1, 1>, scalar_prefetch = 0 : i64, scratch_operands = 1 : i64, tpu.core_type = #tpu.core_type<tc>, window_params = [{transform_indices = @transform_0, window_bounds = array<i64: 128, 128>}, {transform_indices = @transform_1, window_bounds = array<i64: 128, 128>}, {pipeline_mode = #tpu.pipeline_mode<synchronous>, transform_indices = @transform_2, window_bounds = array<i64: 1, 128>}, {transform_indices = @transform_3, window_bounds = array<i64: 128, 128>}]} {
    %c0_i32 = arith.constant 0 : i32
    %0 = arith.cmpi eq, %arg1, %c0_i32 : i32
    %1 = arith.extui %0 : i1 to i32
    %c0_i32_0 = arith.constant 0 : i32
    %2 = arith.cmpi ne, %1, %c0_i32_0 : i32
    scf.if %2 {
      %cst_10 = arith.constant 0.000000e+00 : f32
      %12 = vector.broadcast %cst_10 : f32 to vector<128x128xf32>
      %c0_11 = arith.constant 0 : index
      %c0_12 = arith.constant 0 : index
      %13 = vector.load %arg6[%c0_11, %c0_12] : memref<128x128xf32, #tpu.memory_space<vmem>>, vector<128x128xf32>
      tpu.vector_store %arg6[%c0_11, %c0_12], %12 {strides = array<i32>} : memref<128x128xf32, #tpu.memory_space<vmem>>, vector<128x128xf32>,
    } else {
    }
    %c0 = arith.constant 0 : index
    %c0_1 = arith.constant 0 : index
    %3 = vector.load %arg6[%c0, %c0_1] : memref<128x128xf32, #tpu.memory_space<vmem>>, vector<128x128xf32>
    %c0_2 = arith.constant 0 : index
    %c0_3 = arith.constant 0 : index
    %4 = vector.load %arg2[%c0_2, %c0_3] : memref<128x128xf32, #tpu.memory_space<vmem>>, vector<128x128xf32>
    %c0_4 = arith.constant 0 : index
    %c0_5 = arith.constant 0 : index
    %5 = vector.load %arg3[%c0_4, %c0_5] : memref<128x128xf32, #tpu.memory_space<vmem>>, vector<128x128xf32>
    %cst = arith.constant dense<0.000000e+00> : vector<128x128xf32>
    %6 = tpu.matmul %4, %5, %cst {dimension_numbers = #tpu.dot_dimension_numbers<[1], [0], [0], [1], [0, 0, 1, 1], [], []>} : vector<128x128xf32>, vector<128x128xf32>, vector<128x128xf32> -> vector<128x128xf32>
    %7 = arith.addf %3, %6 : vector<128x128xf32>
    %c0_6 = arith.constant 0 : index
    %c0_7 = arith.constant 0 : index
    %8 = vector.load %arg6[%c0_6, %c0_7] : memref<128x128xf32, #tpu.memory_space<vmem>>, vector<128x128xf32>
    tpu.vector_store %arg6[%c0_6, %c0_7], %7 {strides = array<i32>} : memref<128x128xf32, #tpu.memory_space<vmem>>, vector<128x128xf32>,
    %c0_i32_8 = arith.constant 0 : i32
    %9 = arith.cmpi eq, %arg1, %c0_i32_8 : i32
    %10 = arith.extui %9 : i1 to i32
    %c0_i32_9 = arith.constant 0 : i32
    %11 = arith.cmpi ne, %10, %c0_i32_9 : i32
    scf.if %11 {
      %c0_10 = arith.constant 0 : index
      %c0_11 = arith.constant 0 : index
      %12 = vector.load %arg6[%c0_10, %c0_11] : memref<128x128xf32, #tpu.memory_space<vmem>>, vector<128x128xf32>
      %c0_12 = arith.constant 0 : index
      %c0_13 = arith.constant 0 : index
      %13 = vector.load %arg4[%c0_12, %c0_13] : memref<1x128xf32, #tpu.memory_space<vmem>>, vector<1x128xf32>
      %14 = vector.broadcast %13 : vector<1x128xf32> to vector<128x128xf32>
      %15 = arith.addf %12, %14 : vector<128x128xf32>
      %cst_14 = arith.constant 0.000000e+00 : f32
      %16 = vector.broadcast %cst_14 : f32 to vector<128x128xf32>
      %17 = arith.maximumf %15, %16 : vector<128x128xf32>
      %c0_15 = arith.constant 0 : index
      %c0_16 = arith.constant 0 : index
      %18 = vector.load %arg5[%c0_15, %c0_16] : memref<128x128xf32, #tpu.memory_space<vmem>>, vector<128x128xf32>
      tpu.vector_store %arg5[%c0_15, %c0_16], %17 {strides = array<i32>} : memref<128x128xf32, #tpu.memory_space<vmem>>, vector<128x128xf32>,
    } else {
    }
    return
  }
  func.func @transform_0(%arg0: i32, %arg1: i32) -> (i32, i32) {
    %c0_i32 = arith.constant 0 : i32
    return %arg0, %arg1 : i32, i32
  }
  func.func @transform_1(%arg0: i32, %arg1: i32) -> (i32, i32) {
    %c0_i32 = arith.constant 0 : i32
    %c0_i32_0 = arith.constant 0 : i32
    return %arg1, %c0_i32 : i32, i32
  }
  func.func @transform_2(%arg0: i32, %arg1: i32) -> (i32, i32) {
    %c0_i32 = arith.constant 0 : i32
    %c0_i32_0 = arith.constant 0 : i32
    %c0_i32_1 = arith.constant 0 : i32
    return %c0_i32, %c0_i32_0 : i32, i32
  }
  func.func @transform_3(%arg0: i32, %arg1: i32) -> (i32, i32) {
    %c0_i32 = arith.constant 0 : i32
    %c0_i32_0 = arith.constant 0 : i32
    return %arg0, %c0_i32 : i32, i32
  }
}

</mosaic_0001>

<bundles_post_ra>
// kernel: tpu_custom_call.1
= control target key start
LH: loop header
LB: loop body
LE: loop exit
PB: predicated region body
PF: predicated region fallthrough
CT: control target
= control target key end

     0   :  { %8 = vsyncpa [#allocation4], 0  ;;  %s667_s0 = inlined_call_operand.hbm [shape: f32[128,128], index: 0, kind: input, shape index: {}]   ;;  %s668_s1 = inlined_call_operand.hbm [shape: f32[128,128], index: 1, kind: input, shape index: {}]   ;;  %s669_s2 = inlined_call_operand.vmem [shape: f32[1,128], index: 2, kind: input, shape index: {}]   ;;  %s670_s3 = inlined_call_operand.hbm [shape: f32[128,128], index: 3, kind: output, shape index: {}]  }
   0x1   :  { %9 = vsyncpa [#allocation7], 0 }
   0x2   :  { %10 = vsyncpa [#allocation5], 0  ;;  %s594_s12 = smov [#allocation3]   ;;  %s522_s16 = scalar_lea.hbm %s667_s0, 2048 }
   0x3   :  { %s16_s13 = sshll.u32 %s594_s12, 4  ;;  %p523_p0 = scmp.ne.s32.totalorder %s667_s0, %s522_s16  ;;  %s17_s13 = int_to_ptr.vmem [resolvable:$true] %s16_s13 }
   0x4   :  { %p526_p1 = scmp.lt.u32.totalorder %s522_s16, %s667_s0 }
   0x6   :  { %p528_p2 = pnand %p526_p1, %p523_p0 }
   0x8   :  { %531 = shalt.err (!%p528_p2)
}
   0x9   :  { %s532_s21 = scalar_lea.vmem %s17_s13, 2048  ;;  %p537_p4 = scmp.lt.s32.totalorder %s17_s13, %s17_s13 }
   0xa   :  { %p533_p3 = scmp.ne.s32.totalorder %s17_s13, %s532_s21  ;;  %p538_p5 = scmp.lt.s32.totalorder %s532_s21, %s532_s21 }
   0xc   :  { %p539_p6 = por %p538_p5, %p537_p4 }
   0xe   :  { %p540_p7 = pnand %p539_p6, %p533_p3 }
  0x10   :  { %543 = shalt.err (!%p540_p7)
}
  0x11   :  { %s595_s22 = smov 128   ;;  %s596_s23 = smov 8  }
  0x12   :  { %22 = dma.hbm_to_vmem [thread:$0]  %s667_s0, 2048, %s17_s13, [#allocation4], %s595_s22, %s595_s22, %s596_s23  }
  0x13   :  { %s597_s26 = smov [#allocation6]   ;;  %s544_s30 = scalar_lea.hbm %s668_s1, 2048 }
  0x14   :  { %s28_s27 = sshll.u32 %s597_s26, 4  ;;  %p545_p8 = scmp.ne.s32.totalorder %s668_s1, %s544_s30  ;;  %s29_s27 = int_to_ptr.vmem [resolvable:$true] %s28_s27 }
  0x15   :  { %p548_p9 = scmp.lt.u32.totalorder %s544_s30, %s668_s1 }
  0x17   :  { %p550_p10 = pnand %p548_p9, %p545_p8 }
  0x19   :  { %553 = shalt.err (!%p550_p10)
}
  0x1a   :  { %s554_s8 = scalar_lea.vmem %s29_s27, 2048  ;;  %p559_p12 = scmp.lt.s32.totalorder %s29_s27, %s29_s27 }
  0x1b   :  { %p555_p11 = scmp.ne.s32.totalorder %s29_s27, %s554_s8  ;;  %p560_p13 = scmp.lt.s32.totalorder %s554_s8, %s554_s8 }
  0x1d   :  { %p561_p0 = por %p560_p13, %p559_p12 }
  0x1f   :  { %p562_p1 = pnand %p561_p0, %p555_p11 }
  0x21   :  { %565 = shalt.err (!%p562_p1)
}
  0x22   :  { %34 = dma.hbm_to_vmem [thread:$0]  %s668_s1, 2048, %s29_s27, [#allocation7], %s595_s22, %s595_s22, %s596_s23  }
  0x23   :  { %588 = dma.done.wait [#allocation4], 2048  }
  0x24   :  { %589 = vsyncadd [#allocation4], 4294965248 }
  0x25   :  { %590 = dma.done.wait [#allocation7], 2048  }
  0x26   :  { %591 = vsyncadd [#allocation7], 4294965248  ;;  %v95_v0 = vld [vmem:[#allocation6] sm:$0xff]  ;;  %v96_v1 = vld [vmem:[#allocation6 + $0x8] sm:$0xff] }
  0x27   :  { %v97_v2 = vld [vmem:[#allocation6 + $0x10] sm:$0xff]  ;;  %v469_v3 = vpack.c.bf16 %v96_v1, %v95_v0  ;;  %v98_v4 = vld [vmem:[#allocation6 + $0x18] sm:$0xff]  ;;  %v99_v6 = vld [vmem:[#allocation6 + $0x20] sm:$0xff] }
  0x28   :  { %v473_v5 = vpack.c.bf16 %v98_v4, %v97_v2  ;;  %v100_v7 = vld [vmem:[#allocation6 + $0x28] sm:$0xff]  ;;  %v79_v9 = vld [vmem:[#allocation3] sm:$0xff]  ;;  %v101_v11 = vld [vmem:[#allocation6 + $0x30] sm:$0xff] }
  0x29   :  { %470 = vmatprep.subr.bf16.mxu0 %v469_v3  ;;  %501 = vmatprep.subr.bf16.mxu1 %v469_v3  ;;  %v477_v8 = vpack.c.bf16 %v100_v7, %v99_v6  ;;  %v87_v10 = vld [vmem:[#allocation3 + $0x40] sm:$0xff]  ;;  %v102_v12 = vld [vmem:[#allocation6 + $0x38] sm:$0xff]  ;;  %v104_v15 = vld [vmem:[#allocation6 + $0x48] sm:$0xff] }
  0x2a   :  { %472 = vmatpush3.bf16.msra.mxu0 %v469_v3  ;;  %509 = vmatpush3.bf16.msra.mxu1 %v469_v3  ;;  %v481_v13 = vpack.c.bf16 %v102_v12, %v101_v11  ;;  %v103_v14 = vld [vmem:[#allocation6 + $0x40] sm:$0xff]  ;;  %v105_v17 = vld [vmem:[#allocation6 + $0x50] sm:$0xff]  ;;  %v106_v18 = vld [vmem:[#allocation6 + $0x58] sm:$0xff] }
  0x2b   :  { %474 = vmatprep.subr.bf16.mxu0 %v473_v5  ;;  %502 = vmatprep.subr.bf16.mxu1 %v473_v5  ;;  %v485_v16 = vpack.c.bf16 %v104_v15, %v103_v14  ;;  %v489_v19 = vpack.c.bf16 %v106_v18, %v105_v17  ;;  %v107_v20 = vld [vmem:[#allocation6 + $0x60] sm:$0xff]  ;;  %v108_v21 = vld [vmem:[#allocation6 + $0x68] sm:$0xff]  ;;  %v109_v23 = vld [vmem:[#allocation6 + $0x70] sm:$0xff] }
  0x2c   :  { %445 = vmatprep.mubr.f32.mxu0 %v79_v9  ;;  %457 = vmatprep.mubr.f32.mxu1 %v87_v10  ;;  %v493_v22 = vpack.c.bf16 %v108_v21, %v107_v20  ;;  %v110_v24 = vld [vmem:[#allocation6 + $0x78] sm:$0xff]  ;;  %v80_v26 = vld [vmem:[#allocation3 + $0x8] sm:$0xff]  ;;  %v81_v28 = vld [vmem:[#allocation3 + $0x10] sm:$0xff] }
  0x2d   :  { %v497_v25 = vpack.c.bf16 %v110_v24, %v109_v23  ;;  %v88_v27 = vld [vmem:[#allocation3 + $0x48] sm:$0xff]  ;;  %v89_v29 = vld [vmem:[#allocation3 + $0x50] sm:$0xff]  ;;  %v82_v30 = vld [vmem:[#allocation3 + $0x18] sm:$0xff] }
  0x2e   :  { %476 = vmatpush3.bf16.msra.mxu0 %v473_v5  ;;  %510 = vmatpush3.bf16.msra.mxu1 %v473_v5  ;;  %v90_v31 = vld [vmem:[#allocation3 + $0x58] sm:$0xff]  ;;  %v83_v32 = vld [vmem:[#allocation3 + $0x20] sm:$0xff]  ;;  %v84_v34 = vld [vmem:[#allocation3 + $0x28] sm:$0xff] }
  0x2f   :  { %478 = vmatprep.subr.bf16.mxu0 %v477_v8  ;;  %503 = vmatprep.subr.bf16.mxu1 %v477_v8  ;;  %v91_v33 = vld [vmem:[#allocation3 + $0x60] sm:$0xff]  ;;  %v92_v35 = vld [vmem:[#allocation3 + $0x68] sm:$0xff]  ;;  %v85_v36 = vld [vmem:[#allocation3 + $0x30] sm:$0xff] }
  0x30   :  { %v93_v37 = vld [vmem:[#allocation3 + $0x70] sm:$0xff]  ;;  %v86_v38 = vld [vmem:[#allocation3 + $0x38] sm:$0xff]  ;;  %v380_v40 = vld [vmem:[%s669_s2] ss:$0 sm:$0xff]  ;;  %s598_s2 = smov [#allocation8]  }
  0x31   :  { %v94_v39 = vld [vmem:[#allocation3 + $0x78] sm:$0xff]  ;;  %s367_s11 = sshll.u32 %s598_s2, 4  ;;  %s368_s11 = int_to_ptr.vmem [resolvable:$true] %s367_s11 }
  0x32   :  { %480 = vmatpush3.bf16.msra.mxu0 %v477_v8  ;;  %511 = vmatpush3.bf16.msra.mxu1 %v477_v8  ;;  %s566_s12 = scalar_lea.vmem %s368_s11, 2048  ;;  %p571_p3 = scmp.lt.s32.totalorder %s368_s11, %s368_s11 }
  0x33   :  { %482 = vmatprep.subr.bf16.mxu0 %v481_v13  ;;  %504 = vmatprep.subr.bf16.mxu1 %v481_v13  ;;  %p567_p2 = scmp.ne.s32.totalorder %s368_s11, %s566_s12  ;;  %p572_p4 = scmp.lt.s32.totalorder %s566_s12, %s566_s12 }
  0x35   :  { %p573_p5 = por %p572_p4, %p571_p3 }
  0x36   :  { %484 = vmatpush3.bf16.msra.mxu0 %v481_v13  ;;  %512 = vmatpush3.bf16.msra.mxu1 %v481_v13 }
  0x37   :  { %486 = vmatprep.subr.bf16.mxu0 %v485_v16  ;;  %505 = vmatprep.subr.bf16.mxu1 %v485_v16  ;;  %p574_p6 = pnand %p573_p5, %p567_p2 }
  0x3a   :  { %488 = vmatpush3.bf16.msra.mxu0 %v485_v16  ;;  %513 = vmatpush3.bf16.msra.mxu1 %v485_v16 }
  0x3b   :  { %490 = vmatprep.subr.bf16.mxu0 %v489_v19  ;;  %506 = vmatprep.subr.bf16.mxu1 %v489_v19 }
  0x3e   :  { %492 = vmatpush3.bf16.msra.mxu0 %v489_v19  ;;  %514 = vmatpush3.bf16.msra.mxu1 %v489_v19 }
  0x3f   :  { %494 = vmatprep.subr.bf16.mxu0 %v493_v22  ;;  %507 = vmatprep.subr.bf16.mxu1 %v493_v22 }
  0x42   :  { %496 = vmatpush3.bf16.msra.mxu0 %v493_v22  ;;  %515 = vmatpush3.bf16.msra.mxu1 %v493_v22 }
  0x43   :  { %498 = vmatprep.subr.bf16.mxu0 %v497_v25  ;;  %508 = vmatprep.subr.bf16.mxu1 %v497_v25 }
  0x46   :  { %500 = vmatpush3.bf16.msra.mxu0 %v497_v25  ;;  %516 = vmatpush3.bf16.msra.mxu1 %v497_v25 }
  0x49   :  { %446 = vmatmul.mubr.f32.vlgmr.msra.gmra.mrb[0].mxu0 %v80_v26  ;;  %458 = vmatmul.mubr.f32.vlgmr.msra.gmra.mrb[0].mxu1 %v88_v27 }
  0x4a   :  { %448 = vmatprep.mubr.f32.mxu0 %v81_v28  ;;  %460 = vmatprep.mubr.f32.mxu1 %v89_v29 }
  0x4d   :  { %449 = vmatmul.mubr.f32.gmra.mrb[2].mxu0 %v82_v30  ;;  %461 = vmatmul.mubr.f32.gmra.mrb[2].mxu1 %v90_v31 }
  0x4e   :  { %451 = vmatprep.mubr.f32.mxu0 %v83_v32  ;;  %463 = vmatprep.mubr.f32.mxu1 %v91_v33 }
  0x51   :  { %452 = vmatmul.mubr.f32.gmra.mrb[4].mxu0 %v84_v34  ;;  %464 = vmatmul.mubr.f32.gmra.mrb[4].mxu1 %v92_v35 }
  0x52   :  { %454 = vmatprep.mubr.f32.mxu0 %v85_v36  ;;  %466 = vmatprep.mubr.f32.mxu1 %v93_v37 }
  0x55   :  { %455 = vmatmul.mubr.f32.gmra.mrb[6].mxu0 %v86_v38  ;;  %467 = vmatmul.mubr.f32.gmra.mrb[6].mxu1 %v94_v39 }
 0x11c   :  { %v447_v41 = vpop.f32.mrb[0].mxu0  ;;  %v459_v42 = vpop.f32.mrb[0].mxu1 }
 0x11d   :  { %v315_v43 = vadd.f32 %v447_v41, %v380_v40  ;;  %v323_v44 = vadd.f32 %v459_v42, %v380_v40  ;;  %v177_v45 = vpop.f32.mrb[1].mxu0  ;;  %v217_v46 = vpop.f32.mrb[1].mxu1 }
 0x11e   :  { %v314_v47 = vadd.f32 %v380_v40, %v177_v45  ;;  %v322_v48 = vadd.f32 %v380_v40, %v217_v46 }
 0x11f   :  { %v331_v49 = vmax.f32 %v315_v43, 0.0  ;;  %v339_v50 = vmax.f32 %v323_v44, 0.0 }
 0x120   :  { %v330_v51 = vmax.f32 %v314_v47, 0.0  ;;  %v338_v52 = vmax.f32 %v322_v48, 0.0  ;;  %v450_v53 = vpop.f32.mrb[2].mxu0  ;;  %v462_v54 = vpop.f32.mrb[2].mxu1 }
 0x121   :  { %347 = vst [vmem:[#allocation8 + $0x8] sm:$0xff] %v331_v49  ;;  %355 = vst [vmem:[#allocation8 + $0x48] sm:$0xff] %v339_v50  ;;  %v317_v55 = vadd.f32 %v450_v53, %v380_v40  ;;  %v325_v56 = vadd.f32 %v462_v54, %v380_v40  ;;  %v187_v57 = vpop.f32.mrb[3].mxu0  ;;  %v227_v58 = vpop.f32.mrb[3].mxu1 }
 0x122   :  { %346 = vst [vmem:[#allocation8] sm:$0xff] %v330_v51  ;;  %354 = vst [vmem:[#allocation8 + $0x40] sm:$0xff] %v338_v52  ;;  %v316_v59 = vadd.f32 %v380_v40, %v187_v57  ;;  %v324_v60 = vadd.f32 %v380_v40, %v227_v58 }
 0x123   :  { %v333_v61 = vmax.f32 %v317_v55, 0.0  ;;  %v341_v62 = vmax.f32 %v325_v56, 0.0 }
 0x124   :  { %v332_v63 = vmax.f32 %v316_v59, 0.0  ;;  %v340_v0 = vmax.f32 %v324_v60, 0.0  ;;  %v453_v1 = vpop.f32.mrb[4].mxu0  ;;  %v465_v2 = vpop.f32.mrb[4].mxu1 }
 0x125   :  { %349 = vst [vmem:[#allocation8 + $0x18] sm:$0xff] %v333_v61  ;;  %357 = vst [vmem:[#allocation8 + $0x58] sm:$0xff] %v341_v62  ;;  %v319_v3 = vadd.f32 %v453_v1, %v380_v40  ;;  %v327_v4 = vadd.f32 %v465_v2, %v380_v40  ;;  %v197_v5 = vpop.f32.mrb[5].mxu0  ;;  %v237_v6 = vpop.f32.mrb[5].mxu1 }
 0x126   :  { %348 = vst [vmem:[#allocation8 + $0x10] sm:$0xff] %v332_v63  ;;  %356 = vst [vmem:[#allocation8 + $0x50] sm:$0xff] %v340_v0  ;;  %v318_v7 = vadd.f32 %v380_v40, %v197_v5  ;;  %v326_v8 = vadd.f32 %v380_v40, %v237_v6 }
 0x127   :  { %v335_v9 = vmax.f32 %v319_v3, 0.0  ;;  %v343_v10 = vmax.f32 %v327_v4, 0.0 }
 0x128   :  { %v334_v11 = vmax.f32 %v318_v7, 0.0  ;;  %v342_v12 = vmax.f32 %v326_v8, 0.0  ;;  %v456_v13 = vpop.f32.mrb[6].mxu0  ;;  %v468_v14 = vpop.f32.mrb[6].mxu1 }
 0x129   :  { %351 = vst [vmem:[#allocation8 + $0x28] sm:$0xff] %v335_v9  ;;  %359 = vst [vmem:[#allocation8 + $0x68] sm:$0xff] %v343_v10  ;;  %v321_v15 = vadd.f32 %v456_v13, %v380_v40  ;;  %v329_v16 = vadd.f32 %v468_v14, %v380_v40  ;;  %v207_v17 = vpop.f32.mrb[7].mxu0  ;;  %v247_v18 = vpop.f32.mrb[7].mxu1 }
 0x12a   :  { %350 = vst [vmem:[#allocation8 + $0x20] sm:$0xff] %v334_v11  ;;  %358 = vst [vmem:[#allocation8 + $0x60] sm:$0xff] %v342_v12  ;;  %v320_v19 = vadd.f32 %v380_v40, %v207_v17  ;;  %v328_v20 = vadd.f32 %v380_v40, %v247_v18 }
 0x12b   :  { %v337_v21 = vmax.f32 %v321_v15, 0.0  ;;  %v345_v22 = vmax.f32 %v329_v16, 0.0 }
 0x12c   :  { %v336_v23 = vmax.f32 %v320_v19, 0.0  ;;  %v344_v24 = vmax.f32 %v328_v20, 0.0 }
 0x12d   :  { %353 = vst [vmem:[#allocation8 + $0x38] sm:$0xff] %v337_v21  ;;  %361 = vst [vmem:[#allocation8 + $0x78] sm:$0xff] %v345_v22 }
 0x12e   :  { %352 = vst [vmem:[#allocation8 + $0x30] sm:$0xff] %v336_v23  ;;  %360 = vst [vmem:[#allocation8 + $0x70] sm:$0xff] %v344_v24 }
 0x12f   :  { %577 = shalt.err (!%p574_p6)
}
 0x130   :  { %s578_s15 = scalar_lea.hbm %s670_s3, 2048 }
 0x131   :  { %p579_p7 = scmp.ne.s32.totalorder %s670_s3, %s578_s15  ;;  %p582_p8 = scmp.lt.u32.totalorder %s578_s15, %s670_s3 }
 0x133   :  { %p584_p9 = pnand %p582_p8, %p579_p7 }
 0x135   :  { %587 = shalt.err (!%p584_p9)
}
 0x136   :  { %373 = dma.vmem_to_hbm [thread:$0]  %s368_s11, 2048, %s670_s3, [#allocation5], %s595_s22, %s595_s22, %s596_s23  }
 0x137   :  { %592 = dma.done.wait [#allocation5], 2048  }
 0x138   :  { %593 = vsyncadd [#allocation5], 4294965248 }
 0x139   :  { %377 = vsyncpa [#allocation4], 1 }
 0x13a   :  { %378 = vsyncpa [#allocation7], 1 }
 0x13b   :  { %379 = vsyncpa [#allocation5], 1 }

</bundles_post_ra>
